<compile_context>
chip_gen: v5e
topology: v5e:2x2
jax: 0.10.0
libtpu: 0.0.40
codegen_flags: <defaults>
</compile_context>

<pallas_src>
import jax
import jax.numpy as jnp
import numpy as np
from jax.experimental import pallas as pl
from jax.experimental.pallas import tpu as pltpu


def _make_kernel(N, Cin, Cout, H, W, K, pad):
    HW = H * W

    def kernel(x_ref, mask_ref, w_ref, b_ref, o_ref):
        # x_ref   : (N, Cin, H*W)      f32  flat input images (NCHW, HW merged)
        # mask_ref: (K*K*Cin, H*W)     f32  0/1 'same'-padding validity masks
        # w_ref   : (Cout, K*K*Cin)    bf16 weight matrix
        # b_ref   : (Cout, 1)          f32  bias
        # o_ref   : (N, Cout, H*W)     f32  output (lane-dense)
        mask = mask_ref[...]                              # (KKC, HW)

        per_image = []
        for n in range(N):                                # small N: static unroll
            xv = x_ref[n]                                 # (Cin, HW)
            taps = []
            for kh in range(K):
                for kw in range(K):
                    d = (kh - pad) * W + (kw - pad)       # flat-index shift of tap
                    if d == 0:
                        taps.append(xv)                   # center tap: no roll/mask needed
                    else:
                        # Full-width circular roll; every lane whose tap leaves the
                        # image is zeroed by `mask`, so the wrap-around is harmless.
                        taps.append(pltpu.roll(xv, shift=(-d) % HW, axis=1))
            p = jnp.concatenate(taps, axis=0)             # (KKC, HW), in registers
            per_image.append((p * mask).astype(jnp.bfloat16))

        # Single fused MXU matmul over the whole batch (lane axis = N*HW).
        p_all = jnp.concatenate(per_image, axis=1)        # (KKC, N*HW) bf16
        y = jnp.dot(w_ref[...], p_all,
                    preferred_element_type=jnp.float32)   # (Cout, N*HW) f32
        y = jnp.maximum(y + b_ref[...], 0.0)              # bias + ReLU in f32

        for n in range(N):                                # lane-aligned dense stores
            o_ref[n] = y[:, n * HW:(n + 1) * HW].astype(o_ref.dtype)

    return kernel


def make_conv_relu(weight, bias, H, W):
    """One-time weight/bias/mask prep; returns a jitted forward(x_nchw)."""
    weight = np.asarray(weight, np.float32)
    bias = np.asarray(bias, np.float32)
    Cout, Cin, K, K2 = weight.shape
    assert K == K2, "square kernels only"
    pad = (K - 1) // 2            # PyTorch padding=(K-1)//2 ('same' for odd K)
    HW = H * W
    KKC = K * K * Cin

    # Weight -> (Cout, K*K*Cin) matmul matrix, bf16 for the MXU.
    # im2col row order is tap-major, cin-minor: row = (kh*K + kw)*Cin + ci.
    w_mat = jnp.asarray(weight.transpose(0, 2, 3, 1).reshape(Cout, KKC),
                        dtype=jnp.bfloat16)
    # Bias stays f32 and is added after the matmul (not folded into bf16).
    b_col = jnp.asarray(bias.reshape(Cout, 1), dtype=jnp.float32)

    # Precomputed 0/1 'same'-padding validity masks, one row per (tap, cin).
    jj = np.arange(HW)
    hh, ww = jj // W, jj % W
    tap_mask = np.zeros((K * K, HW), np.float32)
    for kh in range(K):
        for kw in range(K):
            dh, dw = kh - pad, kw - pad
            ok = (hh + dh >= 0) & (hh + dh < H) & (ww + dw >= 0) & (ww + dw < W)
            tap_mask[kh * K + kw] = ok
    mask_full = jnp.asarray(np.repeat(tap_mask, Cin, axis=0))   # (KKC, HW)

    @jax.jit
    def forward(x_nchw):
        N, Cin_x, H_x, W_x = x_nchw.shape
        assert (Cin_x, H_x, W_x) == (Cin, H, W)
        x_flat = x_nchw.reshape(N, Cin, HW)   # NCHW stays NCHW; free reshape

        kernel = _make_kernel(N, Cin, Cout, H, W, K, pad)
        out = pl.pallas_call(
            kernel,
            out_shape=jax.ShapeDtypeStruct((N, Cout, HW), x_nchw.dtype),
            grid_spec=pltpu.PrefetchScalarGridSpec(
                num_scalar_prefetch=0,
                grid=(1,),                     # whole batch in one step
                in_specs=[
                    pl.BlockSpec((N, Cin, HW), lambda i: (0, 0, 0)),
                    pl.BlockSpec((KKC, HW), lambda i: (0, 0)),
                    pl.BlockSpec((Cout, KKC), lambda i: (0, 0)),
                    pl.BlockSpec((Cout, 1), lambda i: (0, 0)),
                ],
                out_specs=pl.BlockSpec((N, Cout, HW), lambda i: (0, 0, 0)),
            ),
            compiler_params=pltpu.CompilerParams(
                dimension_semantics=("arbitrary",),
            ),
        )(x_flat, mask_full, w_mat, b_col)
        return out.reshape(N, Cout, H, W)

    return forward


if __name__ == "__main__":
    # Module config (small, consistent with ConvRelu(in_channels, out_channels, kernel_size))
    N, Cin, H, W = 2, 4, 16, 16
    Cout, K = 8, 3

    key = jax.random.PRNGKey(0)
    k1, k2, k3 = jax.random.split(key, 3)

    x = jax.random.normal(k1, (N, Cin, H, W), dtype=jnp.float32)
    # Deterministic PyTorch-style init: U(-1/sqrt(fan_in), 1/sqrt(fan_in))
    fan_in = Cin * K * K
    bound = 1.0 / (fan_in ** 0.5)
    weight = jax.random.uniform(k2, (Cout, Cin, K, K), jnp.float32, -bound, bound)
    bias = jax.random.uniform(k3, (Cout,), jnp.float32, -bound, bound)

    conv_relu = make_conv_relu(weight, bias, H, W)   # one-time prep (hoisted)
    out = conv_relu(x)
    out = jax.block_until_ready(out)
    assert out.shape == (N, Cout, H, W)

    # Reference: same bf16 operand rounding as the kernel's MXU path, f32 accum.
    xb = x.astype(jnp.bfloat16).astype(jnp.float32)
    wb = weight.astype(jnp.bfloat16).astype(jnp.float32)
    ref = jax.lax.conv_general_dilated(
        xb, wb, window_strides=(1, 1), padding="SAME",
        dimension_numbers=("NCHW", "OIHW", "NCHW"),
        precision=jax.lax.Precision.HIGHEST)
    ref = jnp.maximum(ref + bias.reshape(1, Cout, 1, 1), 0.0)

    err = float(jnp.max(jnp.abs(out - ref)))
    assert jnp.allclose(out, ref, atol=1e-3, rtol=1e-3), f"max abs err = {err}"

    print("KERNEL_OK")
</pallas_src>

<mosaic_0001>
module attributes {stable_mosaic.version = 11 : i64} {
  func.func @kernel(%arg0: i32, %arg1: memref<2x4x256xf32, #tpu.memory_space<vmem>>, %arg2: memref<36x256xf32, #tpu.memory_space<vmem>>, %arg3: memref<8x36xbf16, #tpu.memory_space<vmem>>, %arg4: memref<8x1xf32, #tpu.memory_space<vmem>>, %arg5: memref<2x8x256xf32, #tpu.memory_space<vmem>>) attributes {dimension_semantics = [#tpu.dimension_semantics<arbitrary>], iteration_bounds = array<i64: 1>, scalar_prefetch = 0 : i64, scratch_operands = 0 : i64, tpu.core_type = #tpu.core_type<tc>, window_params = [{pipeline_mode = #tpu.pipeline_mode<synchronous>, transform_indices = @transform_0, window_bounds = array<i64: 2, 4, 256>}, {pipeline_mode = #tpu.pipeline_mode<synchronous>, transform_indices = @transform_1, window_bounds = array<i64: 36, 256>}, {pipeline_mode = #tpu.pipeline_mode<synchronous>, transform_indices = @transform_2, window_bounds = array<i64: 8, 36>}, {pipeline_mode = #tpu.pipeline_mode<synchronous>, transform_indices = @transform_3, window_bounds = array<i64: 8, 1>}, {pipeline_mode = #tpu.pipeline_mode<synchronous>, transform_indices = @transform_4, window_bounds = array<i64: 2, 8, 256>}]} {
    %c0 = arith.constant 0 : index
    %c0_0 = arith.constant 0 : index
    %0 = vector.load %arg2[%c0, %c0_0] : memref<36x256xf32, #tpu.memory_space<vmem>>, vector<36x256xf32>
    %c0_1 = arith.constant 0 : index
    %c0_2 = arith.constant 0 : index
    %c0_3 = arith.constant 0 : index
    %1 = vector.load %arg1[%c0_1, %c0_2, %c0_3] : memref<2x4x256xf32, #tpu.memory_space<vmem>>, vector<1x4x256xf32>
    %2 = vector.shape_cast %1 : vector<1x4x256xf32> to vector<4x256xf32>
    %c17_i32 = arith.constant 17 : i32
    %3 = tpu.dynamic_rotate %2 by %c17_i32 dim 1 : vector<4x256xf32>, i32 -> vector<4x256xf32>
    %c16_i32 = arith.constant 16 : i32
    %4 = tpu.dynamic_rotate %2 by %c16_i32 dim 1 : vector<4x256xf32>, i32 -> vector<4x256xf32>
    %c15_i32 = arith.constant 15 : i32
    %5 = tpu.dynamic_rotate %2 by %c15_i32 dim 1 : vector<4x256xf32>, i32 -> vector<4x256xf32>
    %c1_i32 = arith.constant 1 : i32
    %6 = tpu.dynamic_rotate %2 by %c1_i32 dim 1 : vector<4x256xf32>, i32 -> vector<4x256xf32>
    %c255_i32 = arith.constant 255 : i32
    %7 = tpu.dynamic_rotate %2 by %c255_i32 dim 1 : vector<4x256xf32>, i32 -> vector<4x256xf32>
    %c241_i32 = arith.constant 241 : i32
    %8 = tpu.dynamic_rotate %2 by %c241_i32 dim 1 : vector<4x256xf32>, i32 -> vector<4x256xf32>
    %c240_i32 = arith.constant 240 : i32
    %9 = tpu.dynamic_rotate %2 by %c240_i32 dim 1 : vector<4x256xf32>, i32 -> vector<4x256xf32>
    %c239_i32 = arith.constant 239 : i32
    %10 = tpu.dynamic_rotate %2 by %c239_i32 dim 1 : vector<4x256xf32>, i32 -> vector<4x256xf32>
    %11 = tpu.concatenate %3, %4, %5, %6, %2, %7, %8, %9, %10 in 0 : vector<4x256xf32>, vector<4x256xf32>, vector<4x256xf32>, vector<4x256xf32>, vector<4x256xf32>, vector<4x256xf32>, vector<4x256xf32>, vector<4x256xf32>, vector<4x256xf32> -> vector<36x256xf32>
    %12 = arith.mulf %11, %0 : vector<36x256xf32>
    %13 = arith.truncf %12 : vector<36x256xf32> to vector<36x256xbf16>
    %c1 = arith.constant 1 : index
    %c0_4 = arith.constant 0 : index
    %c0_5 = arith.constant 0 : index
    %14 = vector.load %arg1[%c1, %c0_4, %c0_5] : memref<2x4x256xf32, #tpu.memory_space<vmem>>, vector<1x4x256xf32>
    %15 = vector.shape_cast %14 : vector<1x4x256xf32> to vector<4x256xf32>
    %c17_i32_6 = arith.constant 17 : i32
    %16 = tpu.dynamic_rotate %15 by %c17_i32_6 dim 1 : vector<4x256xf32>, i32 -> vector<4x256xf32>
    %c16_i32_7 = arith.constant 16 : i32
    %17 = tpu.dynamic_rotate %15 by %c16_i32_7 dim 1 : vector<4x256xf32>, i32 -> vector<4x256xf32>
    %c15_i32_8 = arith.constant 15 : i32
    %18 = tpu.dynamic_rotate %15 by %c15_i32_8 dim 1 : vector<4x256xf32>, i32 -> vector<4x256xf32>
    %c1_i32_9 = arith.constant 1 : i32
    %19 = tpu.dynamic_rotate %15 by %c1_i32_9 dim 1 : vector<4x256xf32>, i32 -> vector<4x256xf32>
    %c255_i32_10 = arith.constant 255 : i32
    %20 = tpu.dynamic_rotate %15 by %c255_i32_10 dim 1 : vector<4x256xf32>, i32 -> vector<4x256xf32>
    %c241_i32_11 = arith.constant 241 : i32
    %21 = tpu.dynamic_rotate %15 by %c241_i32_11 dim 1 : vector<4x256xf32>, i32 -> vector<4x256xf32>
    %c240_i32_12 = arith.constant 240 : i32
    %22 = tpu.dynamic_rotate %15 by %c240_i32_12 dim 1 : vector<4x256xf32>, i32 -> vector<4x256xf32>
    %c239_i32_13 = arith.constant 239 : i32
    %23 = tpu.dynamic_rotate %15 by %c239_i32_13 dim 1 : vector<4x256xf32>, i32 -> vector<4x256xf32>
    %24 = tpu.concatenate %16, %17, %18, %19, %15, %20, %21, %22, %23 in 0 : vector<4x256xf32>, vector<4x256xf32>, vector<4x256xf32>, vector<4x256xf32>, vector<4x256xf32>, vector<4x256xf32>, vector<4x256xf32>, vector<4x256xf32>, vector<4x256xf32> -> vector<36x256xf32>
    %25 = arith.mulf %24, %0 : vector<36x256xf32>
    %26 = arith.truncf %25 : vector<36x256xf32> to vector<36x256xbf16>
    %27 = tpu.concatenate %13, %26 in 1 : vector<36x256xbf16>, vector<36x256xbf16> -> vector<36x512xbf16>
    %c0_14 = arith.constant 0 : index
    %c0_15 = arith.constant 0 : index
    %28 = vector.load %arg3[%c0_14, %c0_15] : memref<8x36xbf16, #tpu.memory_space<vmem>>, vector<8x36xbf16>
    %cst = arith.constant dense<0.000000e+00> : vector<8x512xf32>
    %29 = tpu.matmul %28, %27, %cst {dimension_numbers = #tpu.dot_dimension_numbers<[1], [0], [0], [1], [0, 0, 1, 1], [], []>} : vector<8x36xbf16>, vector<36x512xbf16>, vector<8x512xf32> -> vector<8x512xf32>
    %c0_16 = arith.constant 0 : index
    %c0_17 = arith.constant 0 : index
    %30 = vector.load %arg4[%c0_16, %c0_17] : memref<8x1xf32, #tpu.memory_space<vmem>>, vector<8x1xf32>
    %31 = vector.broadcast %30 : vector<8x1xf32> to vector<8x512xf32>
    %32 = arith.addf %29, %31 : vector<8x512xf32>
    %cst_18 = arith.constant 0.000000e+00 : f32
    %33 = vector.broadcast %cst_18 : f32 to vector<8x512xf32>
    %34 = arith.maximumf %32, %33 : vector<8x512xf32>
    %35 = vector.extract_strided_slice %34 {offsets = [0, 0], sizes = [8, 256], strides = [1, 1]} : vector<8x512xf32> to vector<8x256xf32>
    %c0_19 = arith.constant 0 : index
    %c0_20 = arith.constant 0 : index
    %c0_21 = arith.constant 0 : index
    %36 = vector.load %arg5[%c0_19, %c0_20, %c0_21] : memref<2x8x256xf32, #tpu.memory_space<vmem>>, vector<1x8x256xf32>
    %37 = vector.shape_cast %36 : vector<1x8x256xf32> to vector<8x256xf32>
    %38 = vector.shape_cast %35 : vector<8x256xf32> to vector<1x8x256xf32>
    tpu.vector_store %arg5[%c0_19, %c0_20, %c0_21], %38 {strides = array<i32>} : memref<2x8x256xf32, #tpu.memory_space<vmem>>, vector<1x8x256xf32>,
    %39 = vector.extract_strided_slice %34 {offsets = [0, 256], sizes = [8, 256], strides = [1, 1]} : vector<8x512xf32> to vector<8x256xf32>
    %c1_22 = arith.constant 1 : index
    %c0_23 = arith.constant 0 : index
    %c0_24 = arith.constant 0 : index
    %40 = vector.load %arg5[%c1_22, %c0_23, %c0_24] : memref<2x8x256xf32, #tpu.memory_space<vmem>>, vector<1x8x256xf32>
    %41 = vector.shape_cast %40 : vector<1x8x256xf32> to vector<8x256xf32>
    %42 = vector.shape_cast %39 : vector<8x256xf32> to vector<1x8x256xf32>
    tpu.vector_store %arg5[%c1_22, %c0_23, %c0_24], %42 {strides = array<i32>} : memref<2x8x256xf32, #tpu.memory_space<vmem>>, vector<1x8x256xf32>,
    return
  }
  func.func @transform_0(%arg0: i32) -> (i32, i32, i32) {
    %c0_i32 = arith.constant 0 : i32
    %c0_i32_0 = arith.constant 0 : i32
    %c0_i32_1 = arith.constant 0 : i32
    %c0_i32_2 = arith.constant 0 : i32
    return %c0_i32, %c0_i32_0, %c0_i32_1 : i32, i32, i32
  }
  func.func @transform_1(%arg0: i32) -> (i32, i32) {
    %c0_i32 = arith.constant 0 : i32
    %c0_i32_0 = arith.constant 0 : i32
    %c0_i32_1 = arith.constant 0 : i32
    return %c0_i32, %c0_i32_0 : i32, i32
  }
  func.func @transform_2(%arg0: i32) -> (i32, i32) {
    %c0_i32 = arith.constant 0 : i32
    %c0_i32_0 = arith.constant 0 : i32
    %c0_i32_1 = arith.constant 0 : i32
    return %c0_i32, %c0_i32_0 : i32, i32
  }
  func.func @transform_3(%arg0: i32) -> (i32, i32) {
    %c0_i32 = arith.constant 0 : i32
    %c0_i32_0 = arith.constant 0 : i32
    %c0_i32_1 = arith.constant 0 : i32
    return %c0_i32, %c0_i32_0 : i32, i32
  }
  func.func @transform_4(%arg0: i32) -> (i32, i32, i32) {
    %c0_i32 = arith.constant 0 : i32
    %c0_i32_0 = arith.constant 0 : i32
    %c0_i32_1 = arith.constant 0 : i32
    %c0_i32_2 = arith.constant 0 : i32
    return %c0_i32, %c0_i32_0, %c0_i32_1 : i32, i32, i32
  }
}

</mosaic_0001>

<bundles_post_ra>
// kernel: forward.1
= control target key start
LH: loop header
LB: loop body
LE: loop exit
PB: predicated region body
PF: predicated region fallthrough
CT: control target
= control target key end

     0   :  { %s481_s17 = smov 16   ;;  %s482_s18 = smov 127   ;;  %v39_v34 = vlaneseq  ;;  %vm157_vm4 = vcmask 1043456   ;;  %vm385_vm6 = vcmask 1041408   ;;  %vm381_vm10 = vcmask 293888   ;;  %s771_s0 = inlined_call_operand.vmem [shape: f32[2,4,256], index: 0, kind: input, shape index: {}]   ;;  %s772_s1 = inlined_call_operand.vmem [shape: f32[36,256], index: 1, kind: input, shape index: {}]   ;;  %s773_s3 = inlined_call_operand.vmem [shape: f32[8,1], index: 3, kind: input, shape index: {}]   ;;  %s774_s2 = inlined_call_operand.vmem [shape: bf16[8,36], index: 2, kind: input, shape index: {}]   ;;  %s775_s4 = inlined_call_operand.vmem [shape: f32[2,8,256], index: 4, kind: output, shape index: {}]  }
   0x1   :  { %v28_v0 = vld [vmem:[%s771_s0] sm:$0xff]  ;;  %s483_s19 = smov 113   ;;  %s484_s20 = smov 112   ;;  %v463_v17 = vld [vmem:[%s771_s0 + $0x8] sm:$0xff] }
   0x2   :  { %30 = vst [vmem:[#allocation1] ss:$2 sm:$0xff] %v28_v0  ;;  %s485_s21 = smov 111   ;;  %s486_s24 = smov 17   ;;  %v560_v35 = vand.u32 127, %v39_v34  ;;  %v604_v58 = vld [vmem:[%s772_s1 + $0x20] sm:$0xff] }
   0x3   :  { %s487_s0 = smov 15   ;;  %s488_s25 = smov 1   ;;  %v615_v63 = vld [vmem:[%s772_s1 + $0x28] sm:$0xff] }
   0x4   :  { %vm53_vm0 = vcmp.lt.s32.totalorder %v560_v35, 16  ;;  %vm89_vm1 = vcmp.lt.s32.totalorder %v560_v35, 127  ;;  %vm101_vm2 = vcmp.lt.s32.totalorder %v560_v35, 113  ;;  %vm113_vm3 = vcmp.lt.s32.totalorder %v560_v35, 112 }
   0x5   :  { %vm125_vm5 = vcmp.lt.s32.totalorder %v560_v35, 111  ;;  %vm41_vm7 = vcmp.lt.s32.totalorder %v560_v35, 17  ;;  %vm65_vm8 = vcmp.lt.s32.totalorder %v560_v35, 15  ;;  %vm77_vm9 = vcmp.lt.s32.totalorder %v560_v35, 1 }
   0x9   :  { %v518_v1 = vld.sshfl [vmem:[#allocation1] sm:$0xff pattern:$0x75316420]  ;;  %v520_v2 = vld.sshfl [vmem:[#allocation1 + $0x8] sm:$0xff pattern:$0x75316420] }
   0xa   :  { %44 = vst [vmem:[#allocation1] ss:$2 sm:$0xff] %v28_v0 }
  0x11   :  { %v46_v3 = vld.sshfl [vmem:[#allocation1 + $0x8] sm:$0xff pattern:$0x75316420]  ;;  %v45_v4 = vld.sshfl [vmem:[#allocation1] sm:$0xff pattern:$0x75316420] }
  0x12   :  { %51 = vrot.lane.b32.xlu1 %v46_v3, %s481_s17  ;;  %49 = vrot.lane.b32.xlu0 %v45_v4, %s481_s17  ;;  %56 = vst [vmem:[#allocation1] ss:$2 sm:$0xff] %v28_v0  ;;  %v631_v3 = vld [vmem:[%s772_s1 + $0x40] sm:$0xf]  ;;  %v636_v4 = vld [vmem:[%s772_s1 + $0x48] sm:$0xf] }
  0x19   :  { %v524_v5 = vld.sshfl [vmem:[#allocation1] sm:$0xff pattern:$0x75316420]  ;;  %v526_v6 = vld.sshfl [vmem:[#allocation1 + $0x8] sm:$0xff pattern:$0x75316420] }
  0x1a   :  { %68 = vst [vmem:[#allocation1] ss:$2 sm:$0xff] %v28_v0 }
  0x21   :  { %v528_v7 = vld.sshfl [vmem:[#allocation1] sm:$0xff pattern:$0x75316420]  ;;  %v530_v8 = vld.sshfl [vmem:[#allocation1 + $0x8] sm:$0xff pattern:$0x75316420] }
  0x22   :  { %80 = vst [vmem:[#allocation1] ss:$2 sm:$0xff] %v28_v0 }
  0x29   :  { %v82_v9 = vld.sshfl [vmem:[#allocation1 + $0x8] sm:$0xff pattern:$0x75316420]  ;;  %v81_v10 = vld.sshfl [vmem:[#allocation1] sm:$0xff pattern:$0x75316420] }
  0x2a   :  { %87 = vrot.lane.b32.xlu0 %v82_v9, %s482_s18  ;;  %92 = vst [vmem:[#allocation1] ss:$2 sm:$0xff] %v28_v0  ;;  %85 = vrot.lane.b32.xlu2 %v81_v10, %s482_s18 }
  0x31   :  { %v93_v11 = vld.sshfl [vmem:[#allocation1] sm:$0xff pattern:$0x75316420]  ;;  %v94_v12 = vld.sshfl [vmem:[#allocation1 + $0x8] sm:$0xff pattern:$0x75316420] }
  0x32   :  { %97 = vrot.lane.b32.xlu1 %v93_v11, %s483_s19  ;;  %104 = vst [vmem:[#allocation1] ss:$2 sm:$0xff] %v28_v0  ;;  %99 = vrot.lane.b32.xlu2 %v94_v12, %s483_s19 }
  0x39   :  { %v105_v13 = vld.sshfl [vmem:[#allocation1] sm:$0xff pattern:$0x75316420]  ;;  %v106_v14 = vld.sshfl [vmem:[#allocation1 + $0x8] sm:$0xff pattern:$0x75316420] }
  0x3a   :  { %109 = vrot.lane.b32.xlu1 %v105_v13, %s484_s20  ;;  %116 = vst [vmem:[#allocation1] ss:$2 sm:$0xff] %v28_v0  ;;  %111 = vrot.lane.b32.xlu2 %v106_v14, %s484_s20 }
  0x41   :  { %v118_v15 = vld.sshfl [vmem:[#allocation1 + $0x8] sm:$0xff pattern:$0x75316420]  ;;  %v117_v16 = vld.sshfl [vmem:[#allocation1] sm:$0xff pattern:$0x75316420] }
  0x42   :  { %123 = vrot.lane.b32.xlu0 %v118_v15, %s485_s21  ;;  %140 = vst [vmem:[#allocation1] ss:$2 sm:$0xff] %v28_v0  ;;  %121 = vrot.lane.b32.xlu2 %v117_v16, %s485_s21  ;;  %v620_v0 = vld [vmem:[%s772_s1 + $0x30] sm:$0xff] }
  0x49   :  { %v543_v18 = vld.sshfl [vmem:[#allocation1] sm:$0xff pattern:$0x75316420]  ;;  %v545_v19 = vld.sshfl [vmem:[#allocation1 + $0x8] sm:$0xff pattern:$0x75316420] }
  0x4a   :  { %184 = vst [vmem:[#allocation1] ss:$2 sm:$0xff] %v463_v17 }
  0x51   :  { %v186_v20 = vld.sshfl [vmem:[#allocation1 + $0x8] sm:$0xff pattern:$0x75316420]  ;;  %v185_v21 = vld.sshfl [vmem:[#allocation1] sm:$0xff pattern:$0x75316420] }
  0x52   :  { %191 = vrot.lane.b32.xlu1 %v186_v20, %s486_s24  ;;  %189 = vrot.lane.b32.xlu0 %v185_v21, %s486_s24  ;;  %195 = vst [vmem:[#allocation1] ss:$2 sm:$0xff] %v463_v17 }
  0x59   :  { %v196_v22 = vld.sshfl [vmem:[#allocation1] sm:$0xff pattern:$0x75316420]  ;;  %v197_v23 = vld.sshfl [vmem:[#allocation1 + $0x8] sm:$0xff pattern:$0x75316420] }
  0x5a   :  { %200 = vrot.lane.b32.xlu1 %v196_v22, %s481_s17  ;;  %206 = vst [vmem:[#allocation1] ss:$2 sm:$0xff] %v463_v17  ;;  %202 = vrot.lane.b32.xlu2 %v197_v23, %s481_s17 }
  0x61   :  { %v208_v24 = vld.sshfl [vmem:[#allocation1 + $0x8] sm:$0xff pattern:$0x75316420]  ;;  %v207_v25 = vld.sshfl [vmem:[#allocation1] sm:$0xff pattern:$0x75316420] }
  0x62   :  { %213 = vrot.lane.b32.xlu0 %v208_v24, %s487_s0  ;;  %217 = vst [vmem:[#allocation1] ss:$2 sm:$0xff] %v463_v17  ;;  %211 = vrot.lane.b32.xlu2 %v207_v25, %s487_s0 }
  0x69   :  { %v219_v26 = vld.sshfl [vmem:[#allocation1 + $0x8] sm:$0xff pattern:$0x75316420]  ;;  %v218_v27 = vld.sshfl [vmem:[#allocation1] sm:$0xff pattern:$0x75316420] }
  0x6a   :  { %224 = vrot.lane.b32.xlu1 %v219_v26, %s488_s25  ;;  %222 = vrot.lane.b32.xlu0 %v218_v27, %s488_s25  ;;  %228 = vst [vmem:[#allocation1] ss:$2 sm:$0xff] %v463_v17 }
  0x71   :  { %v229_v28 = vld.sshfl [vmem:[#allocation1] sm:$0xff pattern:$0x75316420]  ;;  %v230_v29 = vld.sshfl [vmem:[#allocation1 + $0x8] sm:$0xff pattern:$0x75316420] }
  0x72   :  { %233 = vrot.lane.b32.xlu1 %v229_v28, %s482_s18  ;;  %239 = vst [vmem:[#allocation1] ss:$2 sm:$0xff] %v463_v17 }
  0x79   :  { %v241_v30 = vld.sshfl [vmem:[#allocation1 + $0x8] sm:$0xff pattern:$0x75316420]  ;;  %v240_v31 = vld.sshfl [vmem:[#allocation1] sm:$0xff pattern:$0x75316420] }
  0x7a   :  { %235 = vrot.lane.b32.xlu1 %v230_v29, %s482_s18  ;;  %244 = vrot.lane.b32.xlu0 %v240_v31, %s483_s19  ;;  %250 = vst [vmem:[#allocation1] ss:$2 sm:$0xff] %v463_v17 }
  0x81   :  { %v251_v32 = vld.sshfl [vmem:[#allocation1] sm:$0xff pattern:$0x75316420]  ;;  %v252_v33 = vld.sshfl [vmem:[#allocation1 + $0x8] sm:$0xff pattern:$0x75316420] }
  0x82   :  { %246 = vrot.lane.b32.xlu1 %v241_v30, %s483_s19  ;;  %255 = vrot.lane.b32.xlu2 %v251_v32, %s484_s20  ;;  %261 = vst [vmem:[#allocation1] ss:$2 sm:$0xff] %v463_v17 }
  0x84   :  { %v52_v36 = vpop.permute.xlu1 %51  ;;  %v50_v37 = vpop.permute.xlu0 %49 }
  0x85   :  { %v565_v38 = vsel %vm53_vm0, %v50_v37, %v52_v36  ;;  %v569_v39 = vsel %vm53_vm0, %v52_v36, %v50_v37  ;;  %v86_v42 = vpop.permute.xlu2 %85 }
  0x89   :  { %v262_v40 = vld.sshfl [vmem:[#allocation1] sm:$0xff pattern:$0x75316420]  ;;  %v263_v41 = vld.sshfl [vmem:[#allocation1 + $0x8] sm:$0xff pattern:$0x75316420] }
  0x8a   :  { %35 = vrot.lane.b32.xlu1 %v518_v1, %s486_s24  ;;  %266 = vrot.lane.b32.xlu0 %v262_v40, %s485_s21  ;;  %284 = vst [vmem:[#allocation1] ss:$2 sm:$0xff] %v463_v17  ;;  %v625_v1 = vld [vmem:[%s772_s1 + $0x38] sm:$0xff] }
  0x8b   :  { %257 = vrot.lane.b32.xlu2 %v252_v33, %s484_s20 }
  0x8d   :  { %v100_v43 = vpop.permute.xlu2 %99 }
  0x92   :  { %268 = vrot.lane.b32.xlu0 %v263_v41, %s485_s21  ;;  %63 = vrot.lane.b32.xlu1 %v526_v6, %s487_s0 }
  0x93   :  { %73 = vrot.lane.b32.xlu2 %v528_v7, %s488_s25 }
  0x95   :  { %v112_v46 = vpop.permute.xlu2 %111 }
  0x9a   :  { %75 = vrot.lane.b32.xlu0 %v530_v8, %s488_s25 }
  0x9b   :  { %37 = vrot.lane.b32.xlu2 %v520_v2, %s486_s24 }
  0x9c   :  { %v88_v45 = vpop.permute.xlu0 %87 }
  0x9d   :  { %v90_v47 = vsel %vm89_vm1, %v86_v42, %v88_v45  ;;  %v91_v48 = vsel %vm89_vm1, %v88_v45, %v86_v42  ;;  %v122_v2 = vpop.permute.xlu2 %121  ;;  %v18_v42 = vld [vmem:[%s772_s1] sm:$0xff] }
  0x9e   :  { %v147_v49 = vrot.slane %v90_v47, 4  ;;  %v148_v50 = vrot.slane %v91_v48, 4 }
  0xa0   :  { %v162_v59 = vsel %vm157_vm4, %v543_v18, %v147_v49  ;;  %v163_v60 = vsel %vm157_vm4, %v545_v19, %v148_v50 }
  0xa1   :  { %v171_v6 = vmul.f32 %v163_v60, %v615_v63 }
  0xa2   :  { %61 = vrot.lane.b32.xlu0 %v524_v5, %s487_s0  ;;  %v170_v5 = vmul.f32 %v162_v59, %v604_v58 }
  0xa4   :  { %v98_v44 = vpop.permute.xlu1 %97  ;;  %v178_v14 = vpack.c.bf16 %v171_v6, %v170_v5 }
  0xa5   :  { %v102_v52 = vsel %vm101_vm2, %v98_v44, %v100_v43  ;;  %v103_v53 = vsel %vm101_vm2, %v100_v43, %v98_v44  ;;  %v19_v43 = vld [vmem:[%s772_s1 + $0x8] sm:$0xff] }
  0xa6   :  { %v333_v19 = vunpack.c.l.b16 %v178_v14  ;;  %v334_v21 = vunpack.c.h.b16 %v178_v14 }
  0xac   :  { %v110_v51 = vpop.permute.xlu1 %109 }
  0xad   :  { %v114_v54 = vsel %vm113_vm3, %v110_v51, %v112_v46  ;;  %v115_v55 = vsel %vm113_vm3, %v112_v46, %v110_v51 }
  0xae   :  { %v153_v56 = vrot.slane %v114_v54, 4  ;;  %v154_v57 = vrot.slane %v115_v55, 4 }
  0xb0   :  { %v164_v61 = vsel %vm157_vm4, %v102_v52, %v153_v56  ;;  %v165_v62 = vsel %vm157_vm4, %v103_v53, %v154_v57 }
  0xb1   :  { %v172_v7 = vmul.f32 %v164_v61, %v620_v0  ;;  %v173_v8 = vmul.f32 %v165_v62, %v625_v1  ;;  %v680_v61 = vld [vmem:[%s772_s1 + $0x10] sm:$0xff]  ;;  %v685_v62 = vld [vmem:[%s772_s1 + $0x18] sm:$0xff] }
  0xb3   :  { %v179_v15 = vpack.c.bf16 %v173_v8, %v172_v7 }
  0xb4   :  { %v124_v9 = vpop.permute.xlu0 %123  ;;  %v203_v30 = vpop.permute.xlu2 %202 }
  0xb5   :  { %v126_v10 = vsel %vm125_vm5, %v122_v2, %v124_v9  ;;  %v127_v11 = vsel %vm125_vm5, %v124_v9, %v122_v2  ;;  %v335_v20 = vunpack.c.l.b16 %v179_v15  ;;  %v336_v22 = vunpack.c.h.b16 %v179_v15 }
  0xb6   :  { %v174_v12 = vmul.f32 %v126_v10, %v631_v3  ;;  %v175_v13 = vmul.f32 %v127_v11, %v636_v4 }
  0xb7   :  { %v341_v27 = vpack.c.b16 %v335_v20, %v333_v19  ;;  %v342_v28 = vpack.c.b16 %v336_v22, %v334_v21 }
  0xb8   :  { %v180_v16 = vpack.c.bf16 %v175_v13, %v174_v12 }
  0xba   :  { %v337_v17 = vunpack.c.l.b16 %v180_v16  ;;  %v338_v18 = vunpack.c.h.b16 %v180_v16 }
  0xbc   :  { %v343_v23 = vpack.c.b16 %v337_v17, %v337_v17  ;;  %v344_v24 = vpack.c.b16 %v338_v18, %v338_v18  ;;  %v212_v48 = vpop.permute.xlu2 %211 }
  0xbe   :  { %v387_v25 = vsel %vm385_vm6, %v343_v23, 0  ;;  %v390_v26 = vsel %vm385_vm6, %v344_v24, 0 }
  0xbf   :  { %403 = vmatpush.bf16.msra.mxu0 %v387_v25  ;;  %416 = vmatpush.bf16.msra.mxu1 %v390_v26  ;;  %v130_v26 = vrot.slane %v569_v39, 4 }
  0xc3   :  { %404 = vmatpush.bf16.msra.mxu0 %v341_v27  ;;  %417 = vmatpush.bf16.msra.mxu1 %v342_v28  ;;  %v131_v27 = vrot.slane %v565_v38, 4 }
  0xc4   :  { %v192_v29 = vpop.permute.xlu1 %191  ;;  %v190_v31 = vpop.permute.xlu0 %189 }
  0xc5   :  { %v193_v33 = vsel %vm41_vm7, %v190_v31, %v192_v29  ;;  %v194_v34 = vsel %vm41_vm7, %v192_v29, %v190_v31 }
  0xcc   :  { %v201_v32 = vpop.permute.xlu1 %200 }
  0xcd   :  { %v204_v36 = vsel %vm53_vm0, %v201_v32, %v203_v30  ;;  %v205_v37 = vsel %vm53_vm0, %v203_v30, %v201_v32  ;;  %v285_v30 = vld.sshfl [vmem:[#allocation1] sm:$0xff pattern:$0x75316420] }
  0xce   :  { %v274_v40 = vrot.slane %v205_v37, 4  ;;  %v275_v41 = vrot.slane %v204_v36, 4  ;;  %v286_v36 = vld.sshfl [vmem:[#allocation1 + $0x8] sm:$0xff pattern:$0x75316420] }
  0xd0   :  { %v301_v44 = vsel %vm157_vm4, %v194_v34, %v274_v40  ;;  %v302_v45 = vsel %vm157_vm4, %v193_v33, %v275_v41 }
  0xd1   :  { %v309_v46 = vmul.f32 %v301_v44, %v18_v42  ;;  %v310_v47 = vmul.f32 %v302_v45, %v19_v43 }
  0xd3   :  { %v319_v49 = vpack.c.bf16 %v310_v47, %v309_v46 }
  0xd4   :  { %v214_v50 = vpop.permute.xlu0 %213 }
  0xd5   :  { %v215_v53 = vsel %vm65_vm8, %v212_v48, %v214_v50  ;;  %v216_v54 = vsel %vm65_vm8, %v214_v50, %v212_v48  ;;  %v354_v10 = vunpack.c.l.b16 %v319_v49  ;;  %v355_v12 = vunpack.c.h.b16 %v319_v49 }
  0xdc   :  { %v225_v51 = vpop.permute.xlu1 %224  ;;  %v223_v52 = vpop.permute.xlu0 %222 }
  0xdd   :  { %v226_v55 = vsel %vm77_vm9, %v223_v52, %v225_v51  ;;  %v227_v56 = vsel %vm77_vm9, %v225_v51, %v223_v52  ;;  %v256_v57 = vpop.permute.xlu2 %255  ;;  %v375_v52 = vld [vmem:[%s773_s3] sm:$0xff] }
  0xde   :  { %v280_v59 = vrot.slane %v227_v56, 4  ;;  %v281_v60 = vrot.slane %v226_v55, 4 }
  0xe0   :  { %v303_v2 = vsel %vm157_vm4, %v216_v54, %v280_v59  ;;  %v304_v5 = vsel %vm157_vm4, %v215_v53, %v281_v60  ;;  %v489_v53 = vmov 0  }
  0xe1   :  { %v311_v6 = vmul.f32 %v303_v2, %v680_v61  ;;  %v312_v7 = vmul.f32 %v304_v5, %v685_v62  ;;  %479 = vset.pattern.permute.xlu2 %v489_v53  ;;  %480 = vset.pattern.permute.xlu0 %v489_v53 }
  0xe2   :  { %378 = vperm.xlu2 %479, %v375_v52  }
  0xe3   :  { %v320_v8 = vpack.c.bf16 %v312_v7, %v311_v6 }
  0xe4   :  { %v234_v9 = vpop.permute.xlu1 %233 }
  0xe5   :  { %v356_v11 = vunpack.c.l.b16 %v320_v8  ;;  %v357_v13 = vunpack.c.h.b16 %v320_v8  ;;  %v258_v14 = vpop.permute.xlu2 %257 }
  0xe6   :  { %v259_v24 = vsel %vm113_vm3, %v256_v57, %v258_v14  ;;  %v260_v25 = vsel %vm113_vm3, %v258_v14, %v256_v57 }
  0xe7   :  { %v691_v15 = vpack.c.b16 %v356_v11, %v354_v10  ;;  %v693_v16 = vpack.c.b16 %v357_v13, %v355_v12  ;;  %v297_v37 = vrot.slane %v259_v24, 4  ;;  %v298_v40 = vrot.slane %v260_v25, 4 }
  0xec   :  { %v236_v17 = vpop.permute.xlu1 %235  ;;  %v245_v19 = vpop.permute.xlu0 %244 }
  0xed   :  { %v695_v18 = vpop.permute.xlu2 %73  ;;  %v237_v21 = vsel %vm89_vm1, %v234_v9, %v236_v17  ;;  %v238_v22 = vsel %vm89_vm1, %v236_v17, %v234_v9 }
  0xee   :  { %v291_v31 = vrot.slane %v237_v21, 4  ;;  %v292_v32 = vrot.slane %v238_v22, 4 }
  0xf0   :  { %v305_v47 = vsel %vm157_vm4, %v285_v30, %v291_v31  ;;  %v306_v48 = vsel %vm157_vm4, %v286_v36, %v292_v32 }
  0xf4   :  { %v247_v20 = vpop.permute.xlu1 %246 }
  0xf5   :  { %v38_v23 = vpop.permute.xlu2 %37  ;;  %v248_v38 = vsel %vm101_vm2, %v245_v19, %v247_v20  ;;  %v249_v44 = vsel %vm101_vm2, %v247_v20, %v245_v19 }
  0xf6   :  { %v307_v50 = vsel %vm157_vm4, %v248_v38, %v297_v37  ;;  %v308_v51 = vsel %vm157_vm4, %v249_v44, %v298_v40 }
  0xf7   :  { %v315_v55 = vmul.f32 %v307_v50, %v620_v0  ;;  %v316_v56 = vmul.f32 %v308_v51, %v625_v1 }
  0xfc   :  { %v36_v28 = vpop.permute.xlu1 %35  ;;  %v267_v29 = vpop.permute.xlu0 %266 }
  0xfd   :  { %v42_v33 = vsel %vm41_vm7, %v36_v28, %v38_v23  ;;  %v43_v34 = vsel %vm41_vm7, %v38_v23, %v36_v28 }
  0xfe   :  { %v158_v41 = vsel %vm157_vm4, %v43_v34, %v130_v26  ;;  %v159_v39 = vsel %vm157_vm4, %v42_v33, %v131_v27 }
  0xff   :  { %v166_v45 = vmul.f32 %v158_v41, %v18_v42  ;;  %v167_v46 = vmul.f32 %v159_v39, %v19_v43  ;;  %v313_v42 = vmul.f32 %v305_v47, %v604_v58  ;;  %v314_v43 = vmul.f32 %v306_v48, %v615_v63 }
 0x100   :  { %v322_v58 = vpack.c.bf16 %v316_v56, %v315_v55 }
 0x101   :  { %v719_v49 = vpack.c.bf16 %v167_v46, %v166_v45  ;;  %v321_v6 = vpack.c.bf16 %v314_v43, %v313_v42 }
 0x102   :  { %v360_v1 = vunpack.c.l.b16 %v322_v58  ;;  %v361_v12 = vunpack.c.h.b16 %v322_v58 }
 0x103   :  { %v358_v10 = vunpack.c.l.b16 %v321_v6  ;;  %v359_v11 = vunpack.c.h.b16 %v321_v6  ;;  %v329_v35 = vunpack.c.l.b16 %v719_v49  ;;  %v330_v32 = vunpack.c.h.b16 %v719_v49 }
 0x104   :  { %v269_v54 = vpop.permute.xlu0 %268  ;;  %v64_v20 = vpop.permute.xlu1 %63 }
 0x105   :  { %v270_v57 = vsel %vm125_vm5, %v267_v29, %v269_v54  ;;  %v271_v59 = vsel %vm125_vm5, %v269_v54, %v267_v29  ;;  %v366_v17 = vpack.c.b16 %v360_v1, %v358_v10  ;;  %v367_v19 = vpack.c.b16 %v361_v12, %v359_v11  ;;  %v374_v29 = vld [vmem:[%s774_s2] sm:$0xf] }
 0x106   :  { %v317_v60 = vmul.f32 %v270_v57, %v631_v3  ;;  %v318_v2 = vmul.f32 %v271_v59, %v636_v4 }
 0x108   :  { %v323_v5 = vpack.c.bf16 %v318_v2, %v317_v60 }
 0x10a   :  { %v362_v7 = vunpack.c.l.b16 %v323_v5  ;;  %v363_v63 = vunpack.c.h.b16 %v323_v5 }
 0x10c   :  { %v76_v8 = vpop.permute.xlu0 %75  ;;  %v368_v9 = vpack.c.b16 %v362_v7, %v362_v7  ;;  %v369_v0 = vpack.c.b16 %v363_v63, %v363_v63 }
 0x10d   :  { %v78_v3 = vsel %vm77_vm9, %v695_v18, %v76_v8  ;;  %v79_v4 = vsel %vm77_vm9, %v76_v8, %v695_v18 }
 0x10e   :  { %v393_v13 = vsel %vm385_vm6, %v368_v9, 0  ;;  %v396_v14 = vsel %vm385_vm6, %v369_v0, 0  ;;  %v136_v21 = vrot.slane %v79_v4, 4  ;;  %v137_v22 = vrot.slane %v78_v3, 4 }
 0x10f   :  { %429 = vmatpush.bf16.msra.mxu2 %v393_v13  ;;  %442 = vmatpush.bf16.msra.mxu3 %v396_v14 }
 0x113   :  { %430 = vmatpush.bf16.msra.mxu2 %v366_v17  ;;  %443 = vmatpush.bf16.msra.mxu3 %v367_v19 }
 0x114   :  { %v62_v23 = vpop.permute.xlu0 %61 }
 0x115   :  { %v66_v24 = vsel %vm65_vm8, %v62_v23, %v64_v20  ;;  %v67_v25 = vsel %vm65_vm8, %v64_v20, %v62_v23 }
 0x116   :  { %v160_v26 = vsel %vm157_vm4, %v67_v25, %v136_v21  ;;  %v161_v27 = vsel %vm157_vm4, %v66_v24, %v137_v22 }
 0x117   :  { %v168_v18 = vmul.f32 %v160_v26, %v680_v61  ;;  %v169_v28 = vmul.f32 %v161_v27, %v685_v62  ;;  %431 = vmatpush.bf16.msra.mxu2 %v691_v15  ;;  %444 = vmatpush.bf16.msra.mxu3 %v693_v16 }
 0x119   :  { %v177_v30 = vpack.c.bf16 %v169_v28, %v168_v18 }
 0x11a   :  { %466 = vmatmul.msk.bf16.vlgmr.msra.gmra.mxu2 %vm381_vm10, %v374_v29  ;;  %467 = vmatmul.msk.bf16.vlgmr.msra.gmra.mxu3 %vm381_vm10, %v374_v29 }
 0x11b   :  { %v331_v31 = vunpack.c.l.b16 %v177_v30  ;;  %v332_v61 = vunpack.c.h.b16 %v177_v30 }
 0x11d   :  { %v339_v33 = vpack.c.b16 %v331_v31, %v329_v35  ;;  %v340_v62 = vpack.c.b16 %v332_v61, %v330_v32 }
 0x11f   :  { %405 = vmatpush.bf16.msra.mxu0 %v339_v33  ;;  %418 = vmatpush.bf16.msra.mxu1 %v340_v62 }
 0x122   :  { %464 = vmatmul.msk.bf16.vlgmr.msra.gmra.mxu0 %vm381_vm10, %v374_v29  ;;  %465 = vmatmul.msk.bf16.vlgmr.msra.gmra.mxu1 %vm381_vm10, %v374_v29 }
 0x13c   :  { %v379_v15 = vpop.permute.xlu2 %378 }
 0x19d   :  { %v433_v16 = vpop.f32.mrf.mxu2  ;;  %v446_v34 = vpop.f32.mrf.mxu3 }
 0x19e   :  { %v434_v36 = vadd.f32 %v433_v16, %v379_v15  ;;  %v447_v37 = vadd.f32 %v446_v34, %v379_v15 }
 0x19f   :  { %v407_v40 = vpop.f32.mrf.mxu0  ;;  %v420_v41 = vpop.f32.mrf.mxu1 }
 0x1a0   :  { %v452_v39 = vmax.f32 %v434_v36, 0.0  ;;  %v453_v38 = vmax.f32 %v447_v37, 0.0  ;;  %v408_v44 = vadd.f32 %v407_v40, %v379_v15  ;;  %v421_v45 = vadd.f32 %v420_v41, %v379_v15 }
 0x1a2   :  { %468 = vst [vmem:[%s775_s4 + $0x10] sm:$0xff] %v452_v39  ;;  %v450_v46 = vmax.f32 %v408_v44, 0.0  ;;  %v451_v47 = vmax.f32 %v421_v45, 0.0 }
 0x1a3   :  { %469 = vst [vmem:[%s775_s4 + $0x18] sm:$0xff] %v453_v38 }
 0x1a4   :  { %454 = vst [vmem:[%s775_s4] sm:$0xff] %v450_v46 }
 0x1a5   :  { %455 = vst [vmem:[%s775_s4 + $0x8] sm:$0xff] %v451_v47  ;;  %v435_v48 = vpop.f32.mrf.mxu2  ;;  %v448_v49 = vpop.f32.mrf.mxu3 }
 0x1a7   :  { %v409_v50 = vpop.f32.mrf.mxu0  ;;  %v422_v51 = vpop.f32.mrf.mxu1 }

</bundles_post_ra>
